<compile_context>
chip_gen: v7x
topology: tpu7x:2x2x1
jax: 0.10.0
libtpu: 0.0.40
codegen_flags: <defaults>
</compile_context>

<pallas_src>
import functools

import jax
import jax.numpy as jnp
from jax.experimental import pallas as pl
from jax.experimental.pallas import tpu as pltpu

NUM_ADC_P = 4
NUM_SAMPLES_L = 4
IN_DIM = NUM_ADC_P * NUM_SAMPLES_L   # 16
HID_DIM = 32
OUT_DIM = 16

PACK = 8                      # samples packed per 128-lane row (f32)
PACK_IN = PACK * IN_DIM       # 128
PACK_HID = PACK * HID_DIM     # 256
PACK_OUT = PACK * OUT_DIM     # 128

# Explicit MXU precision (perf review): DEFAULT = bf16 operand passes with f32
# accumulation; keeps the 8x zero-inflated block-diag matmuls cheaper than the
# HBM stream on every TPU generation.  Used identically in kernel + reference.
MXU_PRECISION = jax.lax.Precision.DEFAULT


def _round_up(n, m):
    return ((n + m - 1) // m) * m


def pack_weights(w1, w2):
    """Expand PyTorch-layout weights to block-diagonal packed form (call once)."""
    w1t = jnp.asarray(w1, jnp.float32).T          # (16, 32)
    w2t = jnp.asarray(w2, jnp.float32).T          # (32, 16)
    eye = jnp.eye(PACK, dtype=jnp.float32)
    w1blk = jnp.kron(eye, w1t)                    # (128, 256)
    w2blk = jnp.kron(eye, w2t)                    # (256, 128)
    return w1blk, w2blk


def digital_network_kernel(x_ref, w1_ref, w2_ref, o_ref):
    # x_ref:  (TR, 128)   packed input tile (8 samples per row)
    # w1_ref: (128, 256)  block-diagonal fc1.weight.T (VMEM-resident)
    # w2_ref: (256, 128)  block-diagonal fc2.weight.T (VMEM-resident)
    # o_ref:  (TR, 128)   packed output tile
    h = jnp.dot(x_ref[...], w1_ref[...],
                preferred_element_type=jnp.float32, precision=MXU_PRECISION)
    h = jnp.maximum(h, 0.0)                                        # ReLU (VPU)
    o_ref[...] = jnp.dot(h, w2_ref[...],
                         preferred_element_type=jnp.float32,
                         precision=MXU_PRECISION).astype(o_ref.dtype)


@functools.partial(jax.jit, static_argnames=("tile_rows",))
def digital_network_forward(x, w1blk, w2blk, *, tile_rows=1024):
    """x: (B, 16); w1blk/w2blk from pack_weights().  Returns (B, 16) f32."""
    B = x.shape[0]
    x = jnp.asarray(x, jnp.float32)

    rows = pl.cdiv(B, PACK)               # packed rows of real data
    rows8 = _round_up(rows, 8)            # sublane-align (pads <= 63 samples)
    # Keep >= 2 tiles whenever possible so "parallel" fills both v7x
    # TensorCores; the last tile may be ragged (handled by grid cdiv; rows are
    # independent, so masked overhang rows never contaminate valid rows).
    tr = max(8, min(tile_rows, _round_up(pl.cdiv(rows8, 2), 8)))
    grid = (pl.cdiv(rows8, tr),)

    b_padded = rows8 * PACK
    if b_padded != B:                     # skip the pad copy when aligned
        x = jnp.pad(x, ((0, b_padded - B), (0, 0)))   # zero rows: inert math
    x_packed = x.reshape(rows8, PACK_IN)               # free contiguous reshape

    # VMEM @ tr=1024: 2x512 KiB x-tiles + 2x512 KiB out-tiles + 1 MiB hidden
    # intermediate + 256 KiB weights ~= 3.3 MiB -- far under the default
    # scoped limit.  Keep tr <= ~4096 on v7x (64 MiB physical VMEM) or pass
    # vmem_limit_bytes when sweeping larger.
    out_packed = pl.pallas_call(
        digital_network_kernel,
        out_shape=jax.ShapeDtypeStruct((rows8, PACK_OUT), jnp.float32),
        grid=grid,
        in_specs=[
            pl.BlockSpec((tr, PACK_IN), lambda i: (i, 0)),
            # Constant block index -> DMA'd once, VMEM-resident; single buffer
            # (no point double-buffering a constant operand).
            pl.BlockSpec((PACK_IN, PACK_HID), lambda i: (0, 0),
                         pipeline_mode=pl.Buffered(1)),
            pl.BlockSpec((PACK_HID, PACK_OUT), lambda i: (0, 0),
                         pipeline_mode=pl.Buffered(1)),
        ],
        out_specs=pl.BlockSpec((tr, PACK_OUT), lambda i: (i, 0)),
        compiler_params=pltpu.CompilerParams(
            dimension_semantics=("parallel",)),   # megacore sharding on v7x
    )(x_packed, w1blk, w2blk)

    # Free contiguous reshape back to (B, 16); drop padded rows.
    return out_packed.reshape(b_padded, OUT_DIM)[:B]


def _reference(x, w1, w2):
    # Same explicit MXU precision as the kernel -> apples-to-apples comparison.
    h = jnp.maximum(
        jnp.dot(x, jnp.asarray(w1, jnp.float32).T,
                preferred_element_type=jnp.float32, precision=MXU_PRECISION),
        0.0)
    return jnp.dot(h, jnp.asarray(w2, jnp.float32).T,
                   preferred_element_type=jnp.float32, precision=MXU_PRECISION)


if __name__ == "__main__":
    key = jax.random.PRNGKey(0)
    k_x, k_w1, k_w2 = jax.random.split(key, 3)

    # PyTorch Linear default init: U(-1/sqrt(fan_in), 1/sqrt(fan_in)).
    bound1 = 1.0 / (IN_DIM ** 0.5)
    bound2 = 1.0 / (HID_DIM ** 0.5)
    w1 = jax.random.uniform(k_w1, (HID_DIM, IN_DIM), jnp.float32, -bound1, bound1)
    w2 = jax.random.uniform(k_w2, (OUT_DIM, HID_DIM), jnp.float32, -bound2, bound2)
    w1blk, w2blk = pack_weights(w1, w2)   # packed once, outside the hot path

    # Primary check (B = 8, one packed row group, grid=(1,)).
    B = 8
    x = jax.random.normal(k_x, (B, IN_DIM), dtype=jnp.float32)
    out = jax.block_until_ready(digital_network_forward(x, w1blk, w2blk))
    ref = _reference(x, w1, w2)
    assert out.shape == (B, OUT_DIM), out.shape
    assert jnp.allclose(out, ref, atol=1e-5, rtol=1e-4), "mismatch vs reference (B=8)"

    # Batch not a multiple of 8 (exercises zero-padding path).
    B2 = 37
    x2 = jax.random.normal(jax.random.PRNGKey(1), (B2, IN_DIM), dtype=jnp.float32)
    out2 = jax.block_until_ready(digital_network_forward(x2, w1blk, w2blk))
    ref2 = _reference(x2, w1, w2)
    assert out2.shape == (B2, OUT_DIM), out2.shape
    assert jnp.allclose(out2, ref2, atol=1e-5, rtol=1e-4), "mismatch vs reference (B=37)"

    # Multi-tile grid with a ragged last tile (150 samples -> 19 packed rows
    # -> 24 aligned rows, tr=16 -> grid=(2,), second tile partially OOB).
    B3 = 150
    x3 = jax.random.normal(jax.random.PRNGKey(2), (B3, IN_DIM), dtype=jnp.float32)
    out3 = jax.block_until_ready(digital_network_forward(x3, w1blk, w2blk))
    ref3 = _reference(x3, w1, w2)
    assert out3.shape == (B3, OUT_DIM), out3.shape
    assert jnp.allclose(out3, ref3, atol=1e-5, rtol=1e-4), "mismatch vs reference (B=150)"

    print("KERNEL_OK")
</pallas_src>

<mosaic_0001>
module attributes {stable_mosaic.version = 11 : i64} {
  func.func @digital_network_kernel(%arg0: i32, %arg1: memref<8x128xf32, #tpu.memory_space<vmem>>, %arg2: memref<128x256xf32, #tpu.memory_space<vmem>>, %arg3: memref<256x128xf32, #tpu.memory_space<vmem>>, %arg4: memref<8x128xf32, #tpu.memory_space<vmem>>) attributes {dimension_semantics = [#tpu.dimension_semantics<parallel>], iteration_bounds = array<i64: 1>, scalar_prefetch = 0 : i64, scratch_operands = 0 : i64, tpu.core_type = #tpu.core_type<tc>, window_params = [{transform_indices = @transform_0, window_bounds = array<i64: 8, 128>}, {pipeline_mode = #tpu.pipeline_mode<synchronous>, transform_indices = @transform_1, window_bounds = array<i64: 128, 256>}, {pipeline_mode = #tpu.pipeline_mode<synchronous>, transform_indices = @transform_2, window_bounds = array<i64: 256, 128>}, {transform_indices = @transform_3, window_bounds = array<i64: 8, 128>}]} {
    %c0 = arith.constant 0 : index
    %c0_0 = arith.constant 0 : index
    %0 = vector.load %arg1[%c0, %c0_0] : memref<8x128xf32, #tpu.memory_space<vmem>>, vector<8x128xf32>
    %c0_1 = arith.constant 0 : index
    %c0_2 = arith.constant 0 : index
    %1 = vector.load %arg2[%c0_1, %c0_2] : memref<128x256xf32, #tpu.memory_space<vmem>>, vector<128x256xf32>
    %cst = arith.constant dense<0.000000e+00> : vector<8x256xf32>
    %2 = tpu.matmul %0, %1, %cst {dimension_numbers = #tpu.dot_dimension_numbers<[1], [0], [0], [1], [0, 0, 1, 1], [], []>} : vector<8x128xf32>, vector<128x256xf32>, vector<8x256xf32> -> vector<8x256xf32>
    %cst_3 = arith.constant 0.000000e+00 : f32
    %3 = vector.broadcast %cst_3 : f32 to vector<8x256xf32>
    %4 = arith.maximumf %2, %3 : vector<8x256xf32>
    %c0_4 = arith.constant 0 : index
    %c0_5 = arith.constant 0 : index
    %5 = vector.load %arg3[%c0_4, %c0_5] : memref<256x128xf32, #tpu.memory_space<vmem>>, vector<256x128xf32>
    %cst_6 = arith.constant dense<0.000000e+00> : vector<8x128xf32>
    %6 = tpu.matmul %4, %5, %cst_6 {dimension_numbers = #tpu.dot_dimension_numbers<[1], [0], [0], [1], [0, 0, 1, 1], [], []>} : vector<8x256xf32>, vector<256x128xf32>, vector<8x128xf32> -> vector<8x128xf32>
    %c0_7 = arith.constant 0 : index
    %c0_8 = arith.constant 0 : index
    %7 = vector.load %arg4[%c0_7, %c0_8] : memref<8x128xf32, #tpu.memory_space<vmem>>, vector<8x128xf32>
    tpu.vector_store %arg4[%c0_7, %c0_8], %6 {strides = array<i32>} : memref<8x128xf32, #tpu.memory_space<vmem>>, vector<8x128xf32>,
    return
  }
  func.func @transform_0(%arg0: i32) -> (i32, i32) {
    %c0_i32 = arith.constant 0 : i32
    %c0_i32_0 = arith.constant 0 : i32
    return %arg0, %c0_i32 : i32, i32
  }
  func.func @transform_1(%arg0: i32) -> (i32, i32) {
    %c0_i32 = arith.constant 0 : i32
    %c0_i32_0 = arith.constant 0 : i32
    %c0_i32_1 = arith.constant 0 : i32
    return %c0_i32, %c0_i32_0 : i32, i32
  }
  func.func @transform_2(%arg0: i32) -> (i32, i32) {
    %c0_i32 = arith.constant 0 : i32
    %c0_i32_0 = arith.constant 0 : i32
    %c0_i32_1 = arith.constant 0 : i32
    return %c0_i32, %c0_i32_0 : i32, i32
  }
  func.func @transform_3(%arg0: i32) -> (i32, i32) {
    %c0_i32 = arith.constant 0 : i32
    %c0_i32_0 = arith.constant 0 : i32
    return %arg0, %c0_i32 : i32, i32
  }
}

</mosaic_0001>

<bundles_post_ra>
// kernel: digital_network_forward.1
= control target key start
LH: loop header
LB: loop body
LE: loop exit
PB: predicated region body
PF: predicated region fallthrough
CT: control target
= control target key end

     0   :  { %8 = vsyncpa [#allocation3], 0  ;;  %s468_s0 = inlined_call_operand.vmem [shape: f32[8,128], index: 0, kind: input, shape index: {}]   ;;  %s469_s1 = inlined_call_operand.hbm [shape: f32[128,256], index: 1, kind: input, shape index: {}]   ;;  %s470_s2 = inlined_call_operand.hbm [shape: f32[256,128], index: 2, kind: input, shape index: {}]   ;;  %s471_s3 = inlined_call_operand.vmem [shape: f32[8,128], index: 3, kind: output, shape index: {}]  }
   0x1   :  { %9 = vsyncpa [#allocation5], 0  ;;  %s411_s12 = smov [#allocation2]   ;;  %s363_s16 = scalar_lea.hbm %s469_s1, 4096 }
   0x2   :  { %s17_s13 = sshll.u32 %s411_s12, 4  ;;  %p364_p0 = scmp.ne.s32.totalorder %s469_s1, %s363_s16  ;;  %s18_s13 = int_to_ptr.vmem [resolvable:$true] %s17_s13 }
   0x3   :  { %p367_p1 = scmp.lt.u32.totalorder %s363_s16, %s469_s1 }
   0x5   :  { %p369_p2 = pnand %p367_p1, %p364_p0 }
   0x7   :  { %372 = shalt.err (!%p369_p2)
}
   0x8   :  { %s373_s21 = scalar_lea.vmem %s18_s13, 4096  ;;  %p378_p4 = scmp.lt.s32.totalorder %s18_s13, %s18_s13 }
   0x9   :  { %p374_p3 = scmp.ne.s32.totalorder %s18_s13, %s373_s21  ;;  %p379_p5 = scmp.lt.s32.totalorder %s373_s21, %s373_s21 }
   0xb   :  { %p380_p6 = por %p379_p5, %p378_p4 }
   0xd   :  { %p381_p7 = pnand %p380_p6, %p374_p3 }
   0xf   :  { %384 = shalt.err (!%p381_p7)
}
  0x10   :  { %s412_s22 = smov 256   ;;  %s413_s23 = smov 16  }
  0x11   :  { %23 = dma.hbm_to_vmem [thread:$0]  %s469_s1, 4096, %s18_s13, [#allocation3], %s412_s22, %s412_s22, %s413_s23  }
  0x12   :  { %s414_s26 = smov [#allocation4]   ;;  %s385_s30 = scalar_lea.hbm %s470_s2, 4096 }
  0x13   :  { %s29_s27 = sshll.u32 %s414_s26, 4  ;;  %p386_p8 = scmp.ne.s32.totalorder %s470_s2, %s385_s30  ;;  %s30_s27 = int_to_ptr.vmem [resolvable:$true] %s29_s27 }
  0x14   :  { %p389_p9 = scmp.lt.u32.totalorder %s385_s30, %s470_s2 }
  0x16   :  { %p391_p10 = pnand %p389_p9, %p386_p8 }
  0x18   :  { %394 = shalt.err (!%p391_p10)
}
  0x19   :  { %s395_s8 = scalar_lea.vmem %s30_s27, 4096  ;;  %p400_p12 = scmp.lt.s32.totalorder %s30_s27, %s30_s27 }
  0x1a   :  { %p396_p11 = scmp.ne.s32.totalorder %s30_s27, %s395_s8  ;;  %p401_p13 = scmp.lt.s32.totalorder %s395_s8, %s395_s8 }
  0x1c   :  { %p402_p0 = por %p401_p13, %p400_p12 }
  0x1e   :  { %p403_p1 = pnand %p402_p0, %p396_p11 }
  0x20   :  { %406 = shalt.err (!%p403_p1)
}
  0x21   :  { %s415_s1 = smov 128   ;;  %s416_s9 = smov 8  }
  0x22   :  { %35 = dma.hbm_to_vmem [thread:$0]  %s470_s2, 4096, %s30_s27, [#allocation5], %s415_s1, %s415_s1, %s416_s9  }
  0x23   :  { %407 = dma.done.wait [#allocation3], 4096  }
  0x24   :  { %408 = vsyncadd [#allocation3], 4294963200 }
  0x25   :  { %409 = dma.done.wait [#allocation5], 4096  }
  0x26   :  { %410 = vsyncadd [#allocation5], 4294963200  ;;  %v417_v0 = vmov 0.0   ;;  %v44_v1 = vld [vmem:[#allocation2 + $0x8] sm:$0xff]  ;;  %v46_v2 = vld [vmem:[#allocation2 + $0x18] sm:$0xff] }
  0x27   :  { %139 = vmatprep.mubr.f32.mxu0 %v417_v0  ;;  %v43_v3 = vld [vmem:[#allocation2] sm:$0xff]  ;;  %v292_v4 = vpack.c.bf16 %v46_v2, %v44_v1  ;;  %v45_v5 = vld [vmem:[#allocation2 + $0x10] sm:$0xff]  ;;  %v48_v6 = vld [vmem:[#allocation2 + $0x28] sm:$0xff] }
  0x28   :  { %v50_v7 = vld [vmem:[#allocation2 + $0x38] sm:$0xff]  ;;  %v294_v8 = vpack.c.bf16 %v45_v5, %v43_v3  ;;  %v47_v10 = vld [vmem:[#allocation2 + $0x20] sm:$0xff]  ;;  %v49_v11 = vld [vmem:[#allocation2 + $0x30] sm:$0xff] }
  0x29   :  { %v296_v9 = vpack.c.bf16 %v50_v7, %v48_v6  ;;  %v52_v12 = vld [vmem:[#allocation2 + $0x48] sm:$0xff]  ;;  %293 = vmatprep.subr.bf16.mxu0 %v292_v4  ;;  %v54_v13 = vld [vmem:[#allocation2 + $0x58] sm:$0xff]  ;;  %v298_v14 = vpack.c.bf16 %v49_v11, %v47_v10  ;;  %v51_v16 = vld [vmem:[#allocation2 + $0x40] sm:$0xff] }
  0x2a   :  { %295 = vmatpush1.bf16.msra.mxu0 %v294_v8  ;;  %v300_v15 = vpack.c.bf16 %v54_v13, %v52_v12  ;;  %v53_v17 = vld [vmem:[#allocation2 + $0x50] sm:$0xff]  ;;  %v56_v18 = vld [vmem:[#allocation2 + $0x68] sm:$0xff]  ;;  %v58_v19 = vld [vmem:[#allocation2 + $0x78] sm:$0xff] }
  0x2b   :  { %297 = vmatprep.subr.bf16.mxu0 %v296_v9  ;;  %v302_v20 = vpack.c.bf16 %v53_v17, %v51_v16  ;;  %v304_v21 = vpack.c.bf16 %v58_v19, %v56_v18  ;;  %v55_v22 = vld [vmem:[#allocation2 + $0x60] sm:$0xff]  ;;  %v57_v23 = vld [vmem:[#allocation2 + $0x70] sm:$0xff]  ;;  %v60_v24 = vld [vmem:[#allocation2 + $0x88] sm:$0xff] }
  0x2c   :  { %v62_v25 = vld [vmem:[#allocation2 + $0x98] sm:$0xff]  ;;  %v59_v26 = vld [vmem:[#allocation2 + $0x80] sm:$0xff]  ;;  %v61_v27 = vld [vmem:[#allocation2 + $0x90] sm:$0xff]  ;;  %v306_v31 = vpack.c.bf16 %v57_v23, %v55_v22 }
  0x2d   :  { %v164_v28 = vld [vmem:[#allocation4 + $0x80] sm:$0xff]  ;;  %v165_v29 = vld [vmem:[#allocation4 + $0x88] sm:$0xff]  ;;  %v166_v34 = vld [vmem:[#allocation4 + $0x90] sm:$0xff]  ;;  %v308_v36 = vpack.c.bf16 %v62_v25, %v60_v24  ;;  %v310_v46 = vpack.c.bf16 %v61_v27, %v59_v26 }
  0x2e   :  { %299 = vmatpush1.bf16.msra.mxu0 %v298_v14  ;;  %v148_v30 = vld [vmem:[#allocation4] sm:$0xff]  ;;  %v324_v32 = vpack.c.bf16 %v165_v29, %v164_v28  ;;  %v149_v33 = vld [vmem:[#allocation4 + $0x8] sm:$0xff]  ;;  %v167_v35 = vld [vmem:[#allocation4 + $0x98] sm:$0xff] }
  0x2f   :  { %301 = vmatprep.subr.bf16.mxu0 %v300_v15  ;;  %v326_v37 = vpack.c.bf16 %v149_v33, %v148_v30  ;;  %v328_v38 = vpack.c.bf16 %v167_v35, %v166_v34  ;;  %v150_v39 = vld [vmem:[#allocation4 + $0x10] sm:$0xff]  ;;  %v151_v40 = vld [vmem:[#allocation4 + $0x18] sm:$0xff]  ;;  %v168_v41 = vld [vmem:[#allocation4 + $0xa0] sm:$0xff] }
  0x30   :  { %v64_v42 = vld [vmem:[#allocation2 + $0xa8] sm:$0xff]  ;;  %v66_v43 = vld [vmem:[#allocation2 + $0xb8] sm:$0xff]  ;;  %325 = vmatprep.subr.bf16.mxu1 %v324_v32  ;;  %v330_v45 = vpack.c.bf16 %v151_v40, %v150_v39  ;;  %v63_v47 = vld [vmem:[#allocation2 + $0xa0] sm:$0xff] }
  0x31   :  { %v169_v44 = vld [vmem:[#allocation4 + $0xa8] sm:$0xff]  ;;  %327 = vmatpush3.bf16.msra.mxu1 %v326_v37  ;;  %v152_v49 = vld [vmem:[#allocation4 + $0x20] sm:$0xff]  ;;  %v312_v51 = vpack.c.bf16 %v66_v43, %v64_v42  ;;  %v65_v52 = vld [vmem:[#allocation2 + $0xb0] sm:$0xff] }
  0x32   :  { %303 = vmatpush1.bf16.msra.mxu0 %v302_v20  ;;  %329 = vmatprep.subr.bf16.mxu1 %v328_v38  ;;  %v332_v48 = vpack.c.bf16 %v169_v44, %v168_v41  ;;  %v153_v50 = vld [vmem:[#allocation4 + $0x28] sm:$0xff]  ;;  %v170_v53 = vld [vmem:[#allocation4 + $0xb0] sm:$0xff]  ;;  %v171_v54 = vld [vmem:[#allocation4 + $0xb8] sm:$0xff]  ;;  %v314_v58 = vpack.c.bf16 %v65_v52, %v63_v47 }
  0x33   :  { %305 = vmatprep.subr.bf16.mxu0 %v304_v21  ;;  %v68_v55 = vld [vmem:[#allocation2 + $0xc8] sm:$0xff]  ;;  %v70_v56 = vld [vmem:[#allocation2 + $0xd8] sm:$0xff]  ;;  %v334_v57 = vpack.c.bf16 %v153_v50, %v152_v49  ;;  %v67_v59 = vld [vmem:[#allocation2 + $0xc0] sm:$0xff]  ;;  %v336_v60 = vpack.c.bf16 %v171_v54, %v170_v53 }
  0x34   :  { %v154_v61 = vld [vmem:[#allocation4 + $0x30] sm:$0xff]  ;;  %v155_v62 = vld [vmem:[#allocation4 + $0x38] sm:$0xff]  ;;  %v316_v63 = vpack.c.bf16 %v70_v56, %v68_v55  ;;  %v172_v1 = vld [vmem:[#allocation4 + $0xc0] sm:$0xff] }
  0x35   :  { %331 = vmatpush3.bf16.msra.mxu1 %v330_v45  ;;  %v69_v0 = vld [vmem:[#allocation2 + $0xd0] sm:$0xff]  ;;  %v173_v2 = vld [vmem:[#allocation4 + $0xc8] sm:$0xff]  ;;  %v74_v4 = vld [vmem:[#allocation2 + $0xf8] sm:$0xff]  ;;  %v338_v5 = vpack.c.bf16 %v155_v62, %v154_v61 }
  0x36   :  { %307 = vmatpush1.bf16.msra.mxu0 %v306_v31  ;;  %333 = vmatprep.subr.bf16.mxu1 %v332_v48  ;;  %v72_v3 = vld [vmem:[#allocation2 + $0xe8] sm:$0xff]  ;;  %v318_v6 = vpack.c.bf16 %v69_v0, %v67_v59  ;;  %v71_v7 = vld [vmem:[#allocation2 + $0xe0] sm:$0xff]  ;;  %v340_v8 = vpack.c.bf16 %v173_v2, %v172_v1  ;;  %v73_v12 = vld [vmem:[#allocation2 + $0xf0] sm:$0xff] }
  0x37   :  { %309 = vmatprep.subr.bf16.mxu0 %v308_v36  ;;  %v156_v9 = vld [vmem:[#allocation4 + $0x40] sm:$0xff]  ;;  %v157_v10 = vld [vmem:[#allocation4 + $0x48] sm:$0xff]  ;;  %v320_v11 = vpack.c.bf16 %v74_v4, %v72_v3  ;;  %v174_v13 = vld [vmem:[#allocation4 + $0xd0] sm:$0xff]  ;;  %v322_v16 = vpack.c.bf16 %v73_v12, %v71_v7 }
  0x38   :  { %v175_v14 = vld [vmem:[#allocation4 + $0xd8] sm:$0xff]  ;;  %v342_v15 = vpack.c.bf16 %v157_v10, %v156_v9  ;;  %v158_v18 = vld [vmem:[#allocation4 + $0x50] sm:$0xff]  ;;  %v176_v20 = vld [vmem:[#allocation4 + $0xe0] sm:$0xff] }
  0x39   :  { %335 = vmatpush3.bf16.msra.mxu1 %v334_v57  ;;  %v344_v17 = vpack.c.bf16 %v175_v14, %v174_v13  ;;  %v159_v19 = vld [vmem:[#allocation4 + $0x58] sm:$0xff]  ;;  %v177_v21 = vld [vmem:[#allocation4 + $0xe8] sm:$0xff]  ;;  %v42_v23 = vld [vmem:[%s468_s0] sm:$0xff] }
  0x3a   :  { %311 = vmatpush1.bf16.msra.mxu0 %v310_v46  ;;  %337 = vmatprep.subr.bf16.mxu1 %v336_v60  ;;  %v346_v22 = vpack.c.bf16 %v159_v19, %v158_v18  ;;  %v348_v24 = vpack.c.bf16 %v177_v21, %v176_v20  ;;  %v160_v25 = vld [vmem:[#allocation4 + $0x60] sm:$0xff]  ;;  %v161_v26 = vld [vmem:[#allocation4 + $0x68] sm:$0xff]  ;;  %v178_v28 = vld [vmem:[#allocation4 + $0xf0] sm:$0xff] }
  0x3b   :  { %313 = vmatprep.subr.bf16.mxu0 %v312_v51  ;;  %v350_v27 = vpack.c.bf16 %v161_v26, %v160_v25  ;;  %v179_v29 = vld [vmem:[#allocation4 + $0xf8] sm:$0xff]  ;;  %v162_v31 = vld [vmem:[#allocation4 + $0x70] sm:$0xff] }
  0x3c   :  { %v352_v30 = vpack.c.bf16 %v179_v29, %v178_v28  ;;  %v163_v32 = vld [vmem:[#allocation4 + $0x78] sm:$0xff] }
  0x3d   :  { %339 = vmatpush3.bf16.msra.mxu1 %v338_v5  ;;  %v354_v33 = vpack.c.bf16 %v163_v32, %v162_v31 }
  0x3e   :  { %315 = vmatpush1.bf16.msra.mxu0 %v314_v58  ;;  %341 = vmatprep.subr.bf16.mxu1 %v340_v8 }
  0x3f   :  { %317 = vmatprep.subr.bf16.mxu0 %v316_v63 }
  0x41   :  { %343 = vmatpush3.bf16.msra.mxu1 %v342_v15 }
  0x42   :  { %319 = vmatpush1.bf16.msra.mxu0 %v318_v6  ;;  %345 = vmatprep.subr.bf16.mxu1 %v344_v17 }
  0x43   :  { %321 = vmatprep.subr.bf16.mxu0 %v320_v11 }
  0x45   :  { %347 = vmatpush3.bf16.msra.mxu1 %v346_v22 }
  0x46   :  { %323 = vmatpush1.bf16.msra.mxu0 %v322_v16  ;;  %349 = vmatprep.subr.bf16.mxu1 %v348_v24 }
  0x49   :  { %140 = vmatmul.mubr.f32.vlgmr.msra.gmra.mrb[0].mxu0 %v42_v23  ;;  %351 = vmatpush3.bf16.msra.mxu1 %v350_v27 }
  0x4a   :  { %353 = vmatprep.subr.bf16.mxu1 %v352_v30 }
  0x4d   :  { %355 = vmatpush3.bf16.msra.mxu1 %v354_v33 }
 0x11c   :  { %v141_v34 = vpop.f32.mrb[0].mxu0 }
 0x11d   :  { %v143_v35 = vpop.f32.mrb[1].mxu0  ;;  %v146_v37 = vmax.f32 %v141_v34, 0.0 }
 0x11e   :  { %v147_v36 = vmax.f32 %v143_v35, 0.0 }
 0x120   :  { %244 = vmatprep.mubr.f32.mxu1 %v147_v36 }
 0x121   :  { %245 = vmatmul.mubr.f32.vlgmr.msra.gmra.mrb[0].mxu1 %v146_v37 }
 0x1f4   :  { %v289_v38 = vpop.f32.mrb[0].mxu1 }
 0x1f5   :  { %v290_v39 = vpop.f32.mrb[1].mxu1 }
 0x1f6   :  { %v291_v40 = vadd.f32 %v290_v39, %v289_v38 }
 0x1f8   :  { %250 = vst [vmem:[%s471_s3] sm:$0xff] %v291_v40 }
 0x1f9   :  { %255 = vsyncpa [#allocation3], 1 }
 0x1fa   :  { %256 = vsyncpa [#allocation5], 1 }

</bundles_post_ra>
